<compile_context>
chip_gen: v5e
topology: v5e:2x2
jax: 0.10.0
libtpu: 0.0.40
codegen_flags: <defaults>
</compile_context>

<pallas_src>
import functools
import math

import jax
import jax.numpy as jnp
from jax.experimental import pallas as pl
from jax.experimental.pallas import tpu as pltpu


def _lif_kernel(x_ref, u0_ref, o_ref, *, n_steps, decay, threshold, inv_step,
                sub_rows):
    """One row tile of the LIF recurrence; full step loop runs in-kernel.

    x_ref/u0_ref/o_ref are (r_blk, cols) blocks.  The block is processed in
    (sub_rows, cols) sub-chunks held in vregs; the static step loop is fully
    unrolled so the LLO scheduler can co-issue compare/select/add across steps.
    """
    n_sub = o_ref.shape[0] // sub_rows          # static

    @pl.loop(0, n_sub)
    def _(i):
        r = pl.multiple_of(i * sub_rows, sub_rows)
        x = x_ref[pl.ds(r, sub_rows), :].astype(jnp.float32)
        u = u0_ref[pl.ds(r, sub_rows), :].astype(jnp.float32)
        acc = jnp.zeros_like(x)
        for t in range(n_steps):                # static unroll
            u = u * decay + x
            mask = u > threshold                # == (u / V_th > 0.5) for V_th > 0
            acc = acc + jnp.where(mask, 1.0, 0.0)
            if t + 1 < n_steps:                 # reset is dead after last step
                u = jnp.where(mask, 0.0, u)
        o_ref[pl.ds(r, sub_rows), :] = (acc * inv_step).astype(o_ref.dtype)


def _round_up(n, m):
    return (n + m - 1) // m * m


def _init_mem(key, shape):
    """Matches torch.rand_like(x[0]) * 0.5 (uniform [0, 0.5))."""
    return jax.random.uniform(key, shape, dtype=jnp.float32) * 0.5


def lif_act_forward(x, key, *, step=1, v_th=1.0, decay=0.25,
                    tile_cols=1024, tile_rows=512):
    """JAX/Pallas equivalent of LIF_Act.forward (inference values)."""
    if x.ndim not in (2, 3):
        raise ValueError("LIF_Act expects a 2-D or 3-D input, got shape "
                         f"{x.shape}")
    orig_shape = x.shape
    m = math.prod(orig_shape)

    # Membrane init (host-side RNG; same values fed to kernel and reference).
    u0 = _init_mem(key, orig_shape)

    # ---- lane-dense 2-D layout: (rows, cols), cols a multiple of 128 ----
    cols = min(_round_up(m, 128), _round_up(tile_cols, 128))
    rows = pl.cdiv(m, cols)

    # Row-tile size: multiple of 8 (or the full extent for tiny inputs).
    # For rows >= 16 split into >= 2 tiles so both v7x TensorCores get work.
    if rows < 16:
        r_blk = rows
    elif rows <= tile_rows:
        r_blk = _round_up(pl.cdiv(rows, 2), 8)
    else:
        r_blk = max(8, (tile_rows // 8) * 8)

    rows_pad = pl.cdiv(rows, r_blk) * r_blk      # every row tile is full
    m_pad = rows_pad * cols

    def to_2d(a):
        flat = a.reshape(-1)
        if m_pad != m:                           # pad only when required
            flat = jnp.pad(flat, (0, m_pad - m))
        return flat.reshape(rows_pad, cols)

    x2 = to_2d(x)
    u2 = to_2d(u0)

    # vreg-resident sub-chunk: 8 sublane rows when the tile allows it.
    sub_rows = 8 if (r_blk % 8 == 0) else r_blk

    blk = (r_blk, cols)
    idx = lambda r: (r, 0)

    kernel = pl.pallas_call(
        functools.partial(
            _lif_kernel,
            n_steps=int(step),
            decay=float(decay),
            threshold=float(0.5 * v_th),
            inv_step=float(1.0 / step),
            sub_rows=int(sub_rows),
        ),
        out_shape=jax.ShapeDtypeStruct((rows_pad, cols), jnp.float32),
        grid_spec=pltpu.PrefetchScalarGridSpec(
            num_scalar_prefetch=0,
            grid=(rows_pad // r_blk,),
            in_specs=[
                pl.BlockSpec(blk, idx),          # x   (one DMA per row tile)
                pl.BlockSpec(blk, idx),          # u0  (one DMA per row tile)
            ],
            out_specs=pl.BlockSpec(blk, idx),    # written once per row tile
        ),
        compiler_params=pltpu.CompilerParams(
            dimension_semantics=("parallel",),
            vmem_limit_bytes=48 * 1024 * 1024,
        ),
    )
    out2 = kernel(x2, u2)

    out_flat = out2.reshape(-1)
    if m_pad != m:
        out_flat = out_flat[:m]
    return out_flat.reshape(orig_shape)


def _lif_act_ref(x, u0, *, step, v_th=1.0, decay=0.25):
    """Pure-JAX reference with identical forward math."""
    xf = x.astype(jnp.float32)
    u = u0
    acc = jnp.zeros(x.shape, jnp.float32)
    for _ in range(step):
        u = u * decay + xf
        spike = (u > 0.5 * v_th).astype(jnp.float32)
        u = u * (1.0 - spike)
        acc = acc + spike
    return acc * (1.0 / step)


if __name__ == "__main__":
    root = jax.random.PRNGKey(0)
    ku1, ku2, ku3, ku4, kx1, kx2, kx3, kx4 = jax.random.split(root, 8)

    # Case 1: 2-D input (batch=8, hidden=32), step=4 -> multi-step recurrence.
    x2d = jax.random.normal(kx1, (8, 32), dtype=jnp.float32)
    y2d = lif_act_forward(x2d, ku1, step=4)
    jax.block_until_ready(y2d)
    ref2d = _lif_act_ref(x2d, _init_mem(ku1, x2d.shape), step=4)
    assert y2d.shape == x2d.shape
    assert jnp.allclose(y2d, ref2d, atol=1e-6, rtol=1e-6)

    # Case 2: 3-D input (batch=2, channels=4, features=16), step=1.
    x3d = jax.random.normal(kx2, (2, 4, 16), dtype=jnp.float32)
    y3d = lif_act_forward(x3d, ku2, step=1)
    jax.block_until_ready(y3d)
    ref3d = _lif_act_ref(x3d, _init_mem(ku2, x3d.shape), step=1)
    assert y3d.shape == x3d.shape
    assert jnp.allclose(y3d, ref3d, atol=1e-6, rtol=1e-6)

    # Case 3: odd sizes -> exercises padding and the ragged (non-8) row tile.
    x_odd = jax.random.normal(kx3, (40, 333), dtype=jnp.float32)
    y_odd = lif_act_forward(x_odd, ku3, step=3)
    jax.block_until_ready(y_odd)
    ref_odd = _lif_act_ref(x_odd, _init_mem(ku3, x_odd.shape), step=3)
    assert y_odd.shape == x_odd.shape
    assert jnp.allclose(y_odd, ref_odd, atol=1e-6, rtol=1e-6)

    # Case 4: multi-row-tile path (rows=32 -> 2 parallel grid points, 8-row
    # vreg-resident sub-chunks), step=4.
    x_big = jax.random.normal(kx4, (128, 256), dtype=jnp.float32)
    y_big = lif_act_forward(x_big, ku4, step=4)
    jax.block_until_ready(y_big)
    ref_big = _lif_act_ref(x_big, _init_mem(ku4, x_big.shape), step=4)
    assert y_big.shape == x_big.shape
    assert jnp.allclose(y_big, ref_big, atol=1e-6, rtol=1e-6)

    print("KERNEL_OK")
</pallas_src>

<mosaic_0001>
module attributes {stable_mosaic.version = 11 : i64} {
  func.func @_lif_kernel(%arg0: i32, %arg1: memref<1x256xf32, #tpu.memory_space<vmem>>, %arg2: memref<1x256xf32, #tpu.memory_space<vmem>>, %arg3: memref<1x256xf32, #tpu.memory_space<vmem>>) attributes {dimension_semantics = [#tpu.dimension_semantics<parallel>], iteration_bounds = array<i64: 1>, scalar_prefetch = 0 : i64, scratch_operands = 0 : i64, tpu.core_type = #tpu.core_type<tc>, window_params = [{transform_indices = @transform_0, window_bounds = array<i64: 1, 256>}, {transform_indices = @transform_1, window_bounds = array<i64: 1, 256>}, {transform_indices = @transform_2, window_bounds = array<i64: 1, 256>}]} {
    %c0_i32 = arith.constant 0 : i32
    %c1_i32 = arith.constant 1 : i32
    %0 = arith.muli %c0_i32, %c1_i32 : i32
    %c0_i32_0 = arith.constant 0 : i32
    %1 = arith.addi %c0_i32_0, %0 : i32
    %c1_i32_1 = arith.constant 1 : i32
    %2 = arith.muli %1, %c1_i32_1 : i32
    %3 = tpu.assume_multiple %2, 1 : i32
    %4 = arith.index_cast %3 : i32 to index
    %c0 = arith.constant 0 : index
    %5 = vector.load %arg1[%4, %c0] : memref<1x256xf32, #tpu.memory_space<vmem>>, vector<1x256xf32>
    %6 = arith.index_cast %3 : i32 to index
    %c0_2 = arith.constant 0 : index
    %7 = vector.load %arg2[%6, %c0_2] : memref<1x256xf32, #tpu.memory_space<vmem>>, vector<1x256xf32>
    %cst = arith.constant 0.000000e+00 : f32
    %8 = vector.broadcast %cst : f32 to vector<1x256xf32>
    %cst_3 = arith.constant 2.500000e-01 : f32
    %9 = vector.broadcast %cst_3 : f32 to vector<1x256xf32>
    %10 = arith.mulf %7, %9 : vector<1x256xf32>
    %11 = arith.addf %10, %5 : vector<1x256xf32>
    %cst_4 = arith.constant 5.000000e-01 : f32
    %12 = vector.broadcast %cst_4 : f32 to vector<1x256xf32>
    %13 = arith.cmpf ogt, %11, %12 : vector<1x256xf32>
    %cst_5 = arith.constant 1.000000e+00 : f32
    %cst_6 = arith.constant 0.000000e+00 : f32
    %14 = vector.broadcast %cst_5 : f32 to vector<1x256xf32>
    %15 = vector.broadcast %cst_6 : f32 to vector<1x256xf32>
    %16 = arith.select %13, %14, %15 : vector<1x256xi1>, vector<1x256xf32>
    %17 = arith.addf %8, %16 : vector<1x256xf32>
    %cst_7 = arith.constant 0.000000e+00 : f32
    %18 = vector.broadcast %cst_7 : f32 to vector<1x256xf32>
    %19 = arith.select %13, %18, %11 : vector<1x256xi1>, vector<1x256xf32>
    %cst_8 = arith.constant 2.500000e-01 : f32
    %20 = vector.broadcast %cst_8 : f32 to vector<1x256xf32>
    %21 = arith.mulf %19, %20 : vector<1x256xf32>
    %22 = arith.addf %21, %5 : vector<1x256xf32>
    %cst_9 = arith.constant 5.000000e-01 : f32
    %23 = vector.broadcast %cst_9 : f32 to vector<1x256xf32>
    %24 = arith.cmpf ogt, %22, %23 : vector<1x256xf32>
    %cst_10 = arith.constant 1.000000e+00 : f32
    %cst_11 = arith.constant 0.000000e+00 : f32
    %25 = vector.broadcast %cst_10 : f32 to vector<1x256xf32>
    %26 = vector.broadcast %cst_11 : f32 to vector<1x256xf32>
    %27 = arith.select %24, %25, %26 : vector<1x256xi1>, vector<1x256xf32>
    %28 = arith.addf %17, %27 : vector<1x256xf32>
    %cst_12 = arith.constant 0.000000e+00 : f32
    %29 = vector.broadcast %cst_12 : f32 to vector<1x256xf32>
    %30 = arith.select %24, %29, %22 : vector<1x256xi1>, vector<1x256xf32>
    %cst_13 = arith.constant 2.500000e-01 : f32
    %31 = vector.broadcast %cst_13 : f32 to vector<1x256xf32>
    %32 = arith.mulf %30, %31 : vector<1x256xf32>
    %33 = arith.addf %32, %5 : vector<1x256xf32>
    %cst_14 = arith.constant 5.000000e-01 : f32
    %34 = vector.broadcast %cst_14 : f32 to vector<1x256xf32>
    %35 = arith.cmpf ogt, %33, %34 : vector<1x256xf32>
    %cst_15 = arith.constant 1.000000e+00 : f32
    %cst_16 = arith.constant 0.000000e+00 : f32
    %36 = vector.broadcast %cst_15 : f32 to vector<1x256xf32>
    %37 = vector.broadcast %cst_16 : f32 to vector<1x256xf32>
    %38 = arith.select %35, %36, %37 : vector<1x256xi1>, vector<1x256xf32>
    %39 = arith.addf %28, %38 : vector<1x256xf32>
    %cst_17 = arith.constant 0.000000e+00 : f32
    %40 = vector.broadcast %cst_17 : f32 to vector<1x256xf32>
    %41 = arith.select %35, %40, %33 : vector<1x256xi1>, vector<1x256xf32>
    %cst_18 = arith.constant 2.500000e-01 : f32
    %42 = vector.broadcast %cst_18 : f32 to vector<1x256xf32>
    %43 = arith.mulf %41, %42 : vector<1x256xf32>
    %44 = arith.addf %43, %5 : vector<1x256xf32>
    %cst_19 = arith.constant 5.000000e-01 : f32
    %45 = vector.broadcast %cst_19 : f32 to vector<1x256xf32>
    %46 = arith.cmpf ogt, %44, %45 : vector<1x256xf32>
    %cst_20 = arith.constant 1.000000e+00 : f32
    %cst_21 = arith.constant 0.000000e+00 : f32
    %47 = vector.broadcast %cst_20 : f32 to vector<1x256xf32>
    %48 = vector.broadcast %cst_21 : f32 to vector<1x256xf32>
    %49 = arith.select %46, %47, %48 : vector<1x256xi1>, vector<1x256xf32>
    %50 = arith.addf %39, %49 : vector<1x256xf32>
    %cst_22 = arith.constant 2.500000e-01 : f32
    %51 = vector.broadcast %cst_22 : f32 to vector<1x256xf32>
    %52 = arith.mulf %50, %51 : vector<1x256xf32>
    %53 = arith.index_cast %3 : i32 to index
    %c0_23 = arith.constant 0 : index
    %54 = vector.load %arg3[%53, %c0_23] : memref<1x256xf32, #tpu.memory_space<vmem>>, vector<1x256xf32>
    tpu.vector_store %arg3[%53, %c0_23], %52 {strides = array<i32>} : memref<1x256xf32, #tpu.memory_space<vmem>>, vector<1x256xf32>,
    %c1_i32_24 = arith.constant 1 : i32
    return
  }
  func.func @transform_0(%arg0: i32) -> (i32, i32) {
    %c0_i32 = arith.constant 0 : i32
    %c0_i32_0 = arith.constant 0 : i32
    return %arg0, %c0_i32 : i32, i32
  }
  func.func @transform_1(%arg0: i32) -> (i32, i32) {
    %c0_i32 = arith.constant 0 : i32
    %c0_i32_0 = arith.constant 0 : i32
    return %arg0, %c0_i32 : i32, i32
  }
  func.func @transform_2(%arg0: i32) -> (i32, i32) {
    %c0_i32 = arith.constant 0 : i32
    %c0_i32_0 = arith.constant 0 : i32
    return %arg0, %c0_i32 : i32, i32
  }
}

</mosaic_0001>

<bundles_post_ra>
// kernel: tpu_custom_call.1
= control target key start
LH: loop header
LB: loop body
LE: loop exit
PB: predicated region body
PF: predicated region fallthrough
CT: control target
= control target key end

     0   :  { %7 = vsyncpa [#allocation3], 0  ;;  %s203_s0 = inlined_call_operand.hbm [shape: f32[1,256], index: 0, kind: input, shape index: {}]   ;;  %s204_s1 = inlined_call_operand.hbm [shape: f32[1,256], index: 1, kind: input, shape index: {}]   ;;  %s205_s2 = inlined_call_operand.hbm [shape: f32[1,256], index: 2, kind: output, shape index: {}]  }
   0x1   :  { %8 = vsyncpa [#allocation6], 0 }
   0x2   :  { %9 = vsyncpa [#allocation4], 0  ;;  %s15_s11 = sshll.u32 %s203_s0, 4  ;;  %s175_s12 = smov [#allocation2]   ;;  %s16_s11 = int_to_ptr.hbm [resolvable:$true] %s15_s11 }
   0x3   :  { %s17_s13 = sshll.u32 %s175_s12, 4  ;;  %s26_s16 = sshll.u32 %s204_s1, 4  ;;  %s18_s13 = int_to_ptr.vmem [resolvable:$true] %s17_s13  ;;  %s27_s16 = int_to_ptr.hbm [resolvable:$true] %s26_s16 }
   0x4   :  { %20 = dma.hbm_to_vmem [thread:$0]  %s16_s11, 32, %s18_s13, [#allocation3]  }
   0x5   :  { %s176_s17 = smov [#allocation5]  }
   0x6   :  { %s28_s18 = sshll.u32 %s176_s17, 4  ;;  %s29_s18 = int_to_ptr.vmem [resolvable:$true] %s28_s18 }
   0x7   :  { %31 = dma.hbm_to_vmem [thread:$0]  %s27_s16, 32, %s29_s18, [#allocation6]  }
   0x8   :  { %169 = dma.done.wait [#allocation3], 32  }
   0x9   :  { %170 = vsyncadd [#allocation3], 4294967264 }
   0xa   :  { %171 = dma.done.wait [#allocation6], 32  }
   0xb   :  { %172 = vsyncadd [#allocation6], 4294967264  ;;  %v42_v0 = vld [vmem:[#allocation2] sm:$0x3]  ;;  %v44_v1 = vld [vmem:[#allocation5] sm:$0x3]  ;;  %v70_v19 = vlaneseq }
   0xc   :  { %v45_v2 = vmul.f32 0.25, %v44_v1  ;;  %v177_v9 = vmov 0.0   ;;  %s178_s0 = smov [#allocation7]   ;;  %s82_s21 = sshll.u32 %s205_s2, 4  ;;  %s83_s21 = int_to_ptr.hbm [resolvable:$true] %s82_s21 }
   0xd   :  { %s80_s1 = sshll.u32 %s178_s0, 4  ;;  %vm72_vm4 = vcmp.lt.s32.totalorder %v70_v19, 256  ;;  %s81_s1 = int_to_ptr.vmem [resolvable:$true] %s80_s1 }
   0xe   :  { %v46_v3 = vadd.f32 %v45_v2, %v42_v0 }
  0x10   :  { %vm47_vm0 = vcmp.gt.f32.partialorder %v46_v3, 0.5 }
  0x11   :  { %v50_v4 = vsel %vm47_vm0, 0.0, %v46_v3  ;;  %v48_v10 = vsel %vm47_vm0, 1.0, %v177_v9 }
  0x12   :  { %v51_v5 = vmul.f32 0.25, %v50_v4 }
  0x14   :  { %v52_v6 = vadd.f32 %v51_v5, %v42_v0 }
  0x16   :  { %vm53_vm1 = vcmp.gt.f32.partialorder %v52_v6, 0.5 }
  0x17   :  { %v56_v7 = vsel %vm53_vm1, 0.0, %v52_v6  ;;  %v54_v11 = vsel %vm53_vm1, 1.0, %v177_v9 }
  0x18   :  { %v57_v8 = vmul.f32 0.25, %v56_v7  ;;  %v55_v13 = vadd.f32 %v54_v11, %v48_v10 }
  0x1a   :  { %v58_v12 = vadd.f32 %v57_v8, %v42_v0 }
  0x1c   :  { %vm59_vm2 = vcmp.gt.f32.partialorder %v58_v12, 0.5 }
  0x1d   :  { %v60_v14 = vsel %vm59_vm2, 1.0, %v177_v9  ;;  %v62_v15 = vsel %vm59_vm2, 0.0, %v58_v12 }
  0x1e   :  { %v63_v16 = vmul.f32 0.25, %v62_v15  ;;  %v61_v17 = vadd.f32 %v60_v14, %v55_v13 }
  0x20   :  { %v64_v18 = vadd.f32 %v63_v16, %v42_v0 }
  0x22   :  { %vm65_vm3 = vcmp.gt.f32.partialorder %v64_v18, 0.5 }
  0x23   :  { %v66_v20 = vsel %vm65_vm3, 1.0, %v177_v9 }
  0x24   :  { %v67_v21 = vadd.f32 %v66_v20, %v61_v17 }
  0x26   :  { %v68_v22 = vmul.f32 0.25, %v67_v21 }
  0x28   :  { %74 = vst.msk [vmem:[#allocation7] sm:$0x3] %vm72_vm4, %v68_v22 }
  0x29   :  { %85 = dma.vmem_to_hbm [thread:$0]  %s81_s1, 32, %s83_s21, [#allocation4]  }
  0x2a   :  { %173 = dma.done.wait [#allocation4], 32  }
  0x2b   :  { %174 = vsyncadd [#allocation4], 4294967264 }
  0x2c   :  { %90 = vsyncpa [#allocation3], 1 }
  0x2d   :  { %91 = vsyncpa [#allocation6], 1 }
  0x2e   :  { %92 = vsyncpa [#allocation4], 1 }

</bundles_post_ra>
